<compile_context>
chip_gen: v6e
topology: v6e:2x2x1
jax: 0.10.0
libtpu: 0.0.40
codegen_flags: <defaults>
</compile_context>

<pallas_src>
import jax
import jax.numpy as jnp
from jax.experimental import pallas as pl
from jax.experimental.pallas import tpu as pltpu


def _mlp_kernel(x_ref, w1_ref, b1_ref, w2_ref, b2_ref, o_ref):
    # x_ref : (2, TR, TC) VMEM  -- two feature planes, batch dense in (TR, TC)
    # w1_ref: (2, 10)     SMEM
    # b1_ref: (10,)       SMEM
    # w2_ref: (10,)       SMEM
    # b2_ref: (1,)        SMEM
    # o_ref : (TR, TC)    VMEM
    x0 = x_ref[0]               # (TR, TC)
    x1 = x_ref[1]               # (TR, TC)

    hidden = w1_ref.shape[1]    # 10 (static)

    # Fully unrolled VPU mul-adds: layer-1 neuron j + ReLU fused with the
    # layer-2 weighted sum. Two independent accumulators for ILP.
    acc0 = jnp.zeros_like(x0)
    acc1 = jnp.zeros_like(x0)
    for j in range(hidden):
        h_j = w1_ref[0, j] * x0 + w1_ref[1, j] * x1 + b1_ref[j]
        h_j = jnp.maximum(h_j, 0.0)
        if j % 2 == 0:
            acc0 = acc0 + w2_ref[j] * h_j
        else:
            acc1 = acc1 + w2_ref[j] * h_j
    z = acc0 + acc1 + b2_ref[0]

    # Sigmoid via EUP tanh (numerically safe for all z).
    o_ref[...] = (0.5 * jnp.tanh(0.5 * z) + 0.5).astype(o_ref.dtype)


def mlp_forward(x, w1, b1, w2, b2, *, tile_rows=256, lane_width=1024):
    """x: (B, 2) f32 -> (B, 1) f32.

    Layout: x.T padded to (2, R*C) and viewed as (2, R, C); output is an
    (R, C) slab. C is a multiple of 128 (lanes), R / TR multiples of 8
    (sublanes), so every vreg is fully dense. Tile is (2, TR, C) in /
    (TR, C) out: at TR=256, C=1024 that is 256K batch elements per grid
    step (~6 MiB double-buffered), well under every generation's scoped
    VMEM default.
    """
    B = x.shape[0]
    C = lane_width                               # multiple of 128
    rows = -(-B // C)                            # rows needed to hold B
    TR = min(tile_rows, ((rows + 7) // 8) * 8)   # sublane-dense tile rows
    R = ((rows + TR - 1) // TR) * TR             # total rows (multiple of TR)
    B_pad = R * C

    # TODO(synk): ideally the producer emits the (2, B) / (2, R, C) slab
    # directly so this transpose+pad copy (an XLA pre-pass) is avoided.
    x_t = x.T                                    # (2, B)
    if B_pad != B:
        x_t = jnp.pad(x_t, ((0, 0), (0, B_pad - B)))
    x_slab = x_t.reshape(2, R, C)                # free view of contiguous (2, B_pad)

    grid = (R // TR,)
    smem = pl.BlockSpec(memory_space=pltpu.MemorySpace.SMEM)

    out_slab = pl.pallas_call(
        _mlp_kernel,
        out_shape=jax.ShapeDtypeStruct((R, C), jnp.float32),
        grid=grid,
        in_specs=[
            pl.BlockSpec((2, TR, C), lambda i: (0, i, 0)),   # x tile (pipelined)
            smem,                                            # w1 (2, 10)
            smem,                                            # b1 (10,)
            smem,                                            # w2 (10,)
            smem,                                            # b2 (1,)
        ],
        out_specs=pl.BlockSpec((TR, C), lambda i: (i, 0)),
        compiler_params=pltpu.CompilerParams(
            dimension_semantics=("parallel",),               # shard batch on v7x's 2 TCs
        ),
        cost_estimate=pl.CostEstimate(
            flops=70 * B_pad,
            transcendentals=B_pad,
            bytes_accessed=12 * B_pad,
        ),
    )(x_slab, w1, b1, w2, b2)

    # Row-major flatten matches the (2, B_pad) -> (2, R, C) view.
    return out_slab.reshape(-1)[:B].reshape(B, 1)


def init_params(key):
    """Deterministic init mimicking nn.Linear defaults (uniform +-1/sqrt(fan_in)).

    Weights are stored pre-transposed as (in_features, out_features); the
    second layer's weight/bias are squeezed to 1-D since out_features == 1.
    """
    k1, k2, k3, k4 = jax.random.split(key, 4)
    lim1 = 1.0 / jnp.sqrt(2.0)
    lim2 = 1.0 / jnp.sqrt(10.0)
    w1 = jax.random.uniform(k1, (2, 10), jnp.float32, -lim1, lim1)
    b1 = jax.random.uniform(k2, (10,), jnp.float32, -lim1, lim1)
    w2 = jax.random.uniform(k3, (10,), jnp.float32, -lim2, lim2)
    b2 = jax.random.uniform(k4, (1,), jnp.float32, -lim2, lim2)
    return w1, b1, w2, b2


def reference_forward(x, w1, b1, w2, b2):
    h = jnp.maximum(x @ w1 + b1[None, :], 0.0)            # (B, 10)
    z = h @ w2.reshape(10, 1) + b2.reshape(1, 1)          # (B, 1)
    return jax.nn.sigmoid(z)


if __name__ == "__main__":
    key = jax.random.PRNGKey(0)
    kx, kp = jax.random.split(key)
    w1, b1, w2, b2 = init_params(kp)

    # Small XOR-style batch (single tile after padding).
    B = 8
    x = jax.random.uniform(kx, (B, 2), jnp.float32)
    out = jax.block_until_ready(mlp_forward(x, w1, b1, w2, b2))
    ref = reference_forward(x, w1, b1, w2, b2)
    assert out.shape == (B, 1)
    assert jnp.allclose(out, ref, atol=1e-4, rtol=1e-4)

    # Larger ragged batch (exercises padding + slab layout path).
    B2 = 1300
    x2 = jax.random.uniform(kx, (B2, 2), jnp.float32)
    out2 = jax.block_until_ready(mlp_forward(x2, w1, b1, w2, b2))
    ref2 = reference_forward(x2, w1, b1, w2, b2)
    assert out2.shape == (B2, 1)
    assert jnp.allclose(out2, ref2, atol=1e-4, rtol=1e-4)

    # Multi-tile batch (exercises the grid / pipelining path).
    B3 = 3 * 8 * 1024 + 17
    x3 = jax.random.uniform(kx, (B3, 2), jnp.float32)
    out3 = jax.block_until_ready(mlp_forward(x3, w1, b1, w2, b2, tile_rows=8))
    ref3 = reference_forward(x3, w1, b1, w2, b2)
    assert out3.shape == (B3, 1)
    assert jnp.allclose(out3, ref3, atol=1e-4, rtol=1e-4)

    print("KERNEL_OK")
</pallas_src>

<mosaic_0001>
module attributes {stable_mosaic.version = 11 : i64} {
  func.func @_mlp_kernel(%arg0: i32, %arg1: memref<2x8x1024xf32, #tpu.memory_space<vmem>>, %arg2: memref<2x10xf32, #tpu.memory_space<smem>>, %arg3: memref<10xf32, #tpu.memory_space<smem>>, %arg4: memref<10xf32, #tpu.memory_space<smem>>, %arg5: memref<1xf32, #tpu.memory_space<smem>>, %arg6: memref<8x1024xf32, #tpu.memory_space<vmem>>) attributes {dimension_semantics = [#tpu.dimension_semantics<parallel>], iteration_bounds = array<i64: 1>, scalar_prefetch = 0 : i64, scratch_operands = 0 : i64, tpu.core_type = #tpu.core_type<tc>, window_params = [{transform_indices = @transform_0, window_bounds = array<i64: 2, 8, 1024>}, {transform_indices = @transform_1, window_bounds = array<i64: 2, 10>}, {transform_indices = @transform_2, window_bounds = array<i64: 10>}, {transform_indices = @transform_3, window_bounds = array<i64: 10>}, {transform_indices = @transform_4, window_bounds = array<i64: 1>}, {transform_indices = @transform_5, window_bounds = array<i64: 8, 1024>}]} {
    %c0 = arith.constant 0 : index
    %c0_0 = arith.constant 0 : index
    %c0_1 = arith.constant 0 : index
    %0 = vector.load %arg1[%c0, %c0_0, %c0_1] : memref<2x8x1024xf32, #tpu.memory_space<vmem>>, vector<1x8x1024xf32>
    %1 = vector.shape_cast %0 : vector<1x8x1024xf32> to vector<8x1024xf32>
    %c1 = arith.constant 1 : index
    %c0_2 = arith.constant 0 : index
    %c0_3 = arith.constant 0 : index
    %2 = vector.load %arg1[%c1, %c0_2, %c0_3] : memref<2x8x1024xf32, #tpu.memory_space<vmem>>, vector<1x8x1024xf32>
    %3 = vector.shape_cast %2 : vector<1x8x1024xf32> to vector<8x1024xf32>
    %cst = arith.constant 0.000000e+00 : f32
    %4 = vector.broadcast %cst : f32 to vector<8x1024xf32>
    %cst_4 = arith.constant 0.000000e+00 : f32
    %5 = vector.broadcast %cst_4 : f32 to vector<8x1024xf32>
    %c0_5 = arith.constant 0 : index
    %c0_6 = arith.constant 0 : index
    %6 = memref.load %arg2[%c0_5, %c0_6] : memref<2x10xf32, #tpu.memory_space<smem>>
    %7 = vector.broadcast %6 : f32 to vector<8x1024xf32>
    %8 = arith.mulf %7, %1 : vector<8x1024xf32>
    %c1_7 = arith.constant 1 : index
    %c0_8 = arith.constant 0 : index
    %9 = memref.load %arg2[%c1_7, %c0_8] : memref<2x10xf32, #tpu.memory_space<smem>>
    %10 = vector.broadcast %9 : f32 to vector<8x1024xf32>
    %11 = arith.mulf %10, %3 : vector<8x1024xf32>
    %12 = arith.addf %8, %11 : vector<8x1024xf32>
    %c0_9 = arith.constant 0 : index
    %13 = memref.load %arg3[%c0_9] : memref<10xf32, #tpu.memory_space<smem>>
    %14 = vector.broadcast %13 : f32 to vector<8x1024xf32>
    %15 = arith.addf %12, %14 : vector<8x1024xf32>
    %cst_10 = arith.constant 0.000000e+00 : f32
    %16 = vector.broadcast %cst_10 : f32 to vector<8x1024xf32>
    %17 = arith.maximumf %15, %16 : vector<8x1024xf32>
    %c0_11 = arith.constant 0 : index
    %18 = memref.load %arg4[%c0_11] : memref<10xf32, #tpu.memory_space<smem>>
    %19 = vector.broadcast %18 : f32 to vector<8x1024xf32>
    %20 = arith.mulf %19, %17 : vector<8x1024xf32>
    %21 = arith.addf %4, %20 : vector<8x1024xf32>
    %c0_12 = arith.constant 0 : index
    %c1_13 = arith.constant 1 : index
    %22 = memref.load %arg2[%c0_12, %c1_13] : memref<2x10xf32, #tpu.memory_space<smem>>
    %23 = vector.broadcast %22 : f32 to vector<8x1024xf32>
    %24 = arith.mulf %23, %1 : vector<8x1024xf32>
    %c1_14 = arith.constant 1 : index
    %c1_15 = arith.constant 1 : index
    %25 = memref.load %arg2[%c1_14, %c1_15] : memref<2x10xf32, #tpu.memory_space<smem>>
    %26 = vector.broadcast %25 : f32 to vector<8x1024xf32>
    %27 = arith.mulf %26, %3 : vector<8x1024xf32>
    %28 = arith.addf %24, %27 : vector<8x1024xf32>
    %c1_16 = arith.constant 1 : index
    %29 = memref.load %arg3[%c1_16] : memref<10xf32, #tpu.memory_space<smem>>
    %30 = vector.broadcast %29 : f32 to vector<8x1024xf32>
    %31 = arith.addf %28, %30 : vector<8x1024xf32>
    %cst_17 = arith.constant 0.000000e+00 : f32
    %32 = vector.broadcast %cst_17 : f32 to vector<8x1024xf32>
    %33 = arith.maximumf %31, %32 : vector<8x1024xf32>
    %c1_18 = arith.constant 1 : index
    %34 = memref.load %arg4[%c1_18] : memref<10xf32, #tpu.memory_space<smem>>
    %35 = vector.broadcast %34 : f32 to vector<8x1024xf32>
    %36 = arith.mulf %35, %33 : vector<8x1024xf32>
    %37 = arith.addf %5, %36 : vector<8x1024xf32>
    %c0_19 = arith.constant 0 : index
    %c2 = arith.constant 2 : index
    %38 = memref.load %arg2[%c0_19, %c2] : memref<2x10xf32, #tpu.memory_space<smem>>
    %39 = vector.broadcast %38 : f32 to vector<8x1024xf32>
    %40 = arith.mulf %39, %1 : vector<8x1024xf32>
    %c1_20 = arith.constant 1 : index
    %c2_21 = arith.constant 2 : index
    %41 = memref.load %arg2[%c1_20, %c2_21] : memref<2x10xf32, #tpu.memory_space<smem>>
    %42 = vector.broadcast %41 : f32 to vector<8x1024xf32>
    %43 = arith.mulf %42, %3 : vector<8x1024xf32>
    %44 = arith.addf %40, %43 : vector<8x1024xf32>
    %c2_22 = arith.constant 2 : index
    %45 = memref.load %arg3[%c2_22] : memref<10xf32, #tpu.memory_space<smem>>
    %46 = vector.broadcast %45 : f32 to vector<8x1024xf32>
    %47 = arith.addf %44, %46 : vector<8x1024xf32>
    %cst_23 = arith.constant 0.000000e+00 : f32
    %48 = vector.broadcast %cst_23 : f32 to vector<8x1024xf32>
    %49 = arith.maximumf %47, %48 : vector<8x1024xf32>
    %c2_24 = arith.constant 2 : index
    %50 = memref.load %arg4[%c2_24] : memref<10xf32, #tpu.memory_space<smem>>
    %51 = vector.broadcast %50 : f32 to vector<8x1024xf32>
    %52 = arith.mulf %51, %49 : vector<8x1024xf32>
    %53 = arith.addf %21, %52 : vector<8x1024xf32>
    %c0_25 = arith.constant 0 : index
    %c3 = arith.constant 3 : index
    %54 = memref.load %arg2[%c0_25, %c3] : memref<2x10xf32, #tpu.memory_space<smem>>
    %55 = vector.broadcast %54 : f32 to vector<8x1024xf32>
    %56 = arith.mulf %55, %1 : vector<8x1024xf32>
    %c1_26 = arith.constant 1 : index
    %c3_27 = arith.constant 3 : index
    %57 = memref.load %arg2[%c1_26, %c3_27] : memref<2x10xf32, #tpu.memory_space<smem>>
    %58 = vector.broadcast %57 : f32 to vector<8x1024xf32>
    %59 = arith.mulf %58, %3 : vector<8x1024xf32>
    %60 = arith.addf %56, %59 : vector<8x1024xf32>
    %c3_28 = arith.constant 3 : index
    %61 = memref.load %arg3[%c3_28] : memref<10xf32, #tpu.memory_space<smem>>
    %62 = vector.broadcast %61 : f32 to vector<8x1024xf32>
    %63 = arith.addf %60, %62 : vector<8x1024xf32>
    %cst_29 = arith.constant 0.000000e+00 : f32
    %64 = vector.broadcast %cst_29 : f32 to vector<8x1024xf32>
    %65 = arith.maximumf %63, %64 : vector<8x1024xf32>
    %c3_30 = arith.constant 3 : index
    %66 = memref.load %arg4[%c3_30] : memref<10xf32, #tpu.memory_space<smem>>
    %67 = vector.broadcast %66 : f32 to vector<8x1024xf32>
    %68 = arith.mulf %67, %65 : vector<8x1024xf32>
    %69 = arith.addf %37, %68 : vector<8x1024xf32>
    %c0_31 = arith.constant 0 : index
    %c4 = arith.constant 4 : index
    %70 = memref.load %arg2[%c0_31, %c4] : memref<2x10xf32, #tpu.memory_space<smem>>
    %71 = vector.broadcast %70 : f32 to vector<8x1024xf32>
    %72 = arith.mulf %71, %1 : vector<8x1024xf32>
    %c1_32 = arith.constant 1 : index
    %c4_33 = arith.constant 4 : index
    %73 = memref.load %arg2[%c1_32, %c4_33] : memref<2x10xf32, #tpu.memory_space<smem>>
    %74 = vector.broadcast %73 : f32 to vector<8x1024xf32>
    %75 = arith.mulf %74, %3 : vector<8x1024xf32>
    %76 = arith.addf %72, %75 : vector<8x1024xf32>
    %c4_34 = arith.constant 4 : index
    %77 = memref.load %arg3[%c4_34] : memref<10xf32, #tpu.memory_space<smem>>
    %78 = vector.broadcast %77 : f32 to vector<8x1024xf32>
    %79 = arith.addf %76, %78 : vector<8x1024xf32>
    %cst_35 = arith.constant 0.000000e+00 : f32
    %80 = vector.broadcast %cst_35 : f32 to vector<8x1024xf32>
    %81 = arith.maximumf %79, %80 : vector<8x1024xf32>
    %c4_36 = arith.constant 4 : index
    %82 = memref.load %arg4[%c4_36] : memref<10xf32, #tpu.memory_space<smem>>
    %83 = vector.broadcast %82 : f32 to vector<8x1024xf32>
    %84 = arith.mulf %83, %81 : vector<8x1024xf32>
    %85 = arith.addf %53, %84 : vector<8x1024xf32>
    %c0_37 = arith.constant 0 : index
    %c5 = arith.constant 5 : index
    %86 = memref.load %arg2[%c0_37, %c5] : memref<2x10xf32, #tpu.memory_space<smem>>
    %87 = vector.broadcast %86 : f32 to vector<8x1024xf32>
    %88 = arith.mulf %87, %1 : vector<8x1024xf32>
    %c1_38 = arith.constant 1 : index
    %c5_39 = arith.constant 5 : index
    %89 = memref.load %arg2[%c1_38, %c5_39] : memref<2x10xf32, #tpu.memory_space<smem>>
    %90 = vector.broadcast %89 : f32 to vector<8x1024xf32>
    %91 = arith.mulf %90, %3 : vector<8x1024xf32>
    %92 = arith.addf %88, %91 : vector<8x1024xf32>
    %c5_40 = arith.constant 5 : index
    %93 = memref.load %arg3[%c5_40] : memref<10xf32, #tpu.memory_space<smem>>
    %94 = vector.broadcast %93 : f32 to vector<8x1024xf32>
    %95 = arith.addf %92, %94 : vector<8x1024xf32>
    %cst_41 = arith.constant 0.000000e+00 : f32
    %96 = vector.broadcast %cst_41 : f32 to vector<8x1024xf32>
    %97 = arith.maximumf %95, %96 : vector<8x1024xf32>
    %c5_42 = arith.constant 5 : index
    %98 = memref.load %arg4[%c5_42] : memref<10xf32, #tpu.memory_space<smem>>
    %99 = vector.broadcast %98 : f32 to vector<8x1024xf32>
    %100 = arith.mulf %99, %97 : vector<8x1024xf32>
    %101 = arith.addf %69, %100 : vector<8x1024xf32>
    %c0_43 = arith.constant 0 : index
    %c6 = arith.constant 6 : index
    %102 = memref.load %arg2[%c0_43, %c6] : memref<2x10xf32, #tpu.memory_space<smem>>
    %103 = vector.broadcast %102 : f32 to vector<8x1024xf32>
    %104 = arith.mulf %103, %1 : vector<8x1024xf32>
    %c1_44 = arith.constant 1 : index
    %c6_45 = arith.constant 6 : index
    %105 = memref.load %arg2[%c1_44, %c6_45] : memref<2x10xf32, #tpu.memory_space<smem>>
    %106 = vector.broadcast %105 : f32 to vector<8x1024xf32>
    %107 = arith.mulf %106, %3 : vector<8x1024xf32>
    %108 = arith.addf %104, %107 : vector<8x1024xf32>
    %c6_46 = arith.constant 6 : index
    %109 = memref.load %arg3[%c6_46] : memref<10xf32, #tpu.memory_space<smem>>
    %110 = vector.broadcast %109 : f32 to vector<8x1024xf32>
    %111 = arith.addf %108, %110 : vector<8x1024xf32>
    %cst_47 = arith.constant 0.000000e+00 : f32
    %112 = vector.broadcast %cst_47 : f32 to vector<8x1024xf32>
    %113 = arith.maximumf %111, %112 : vector<8x1024xf32>
    %c6_48 = arith.constant 6 : index
    %114 = memref.load %arg4[%c6_48] : memref<10xf32, #tpu.memory_space<smem>>
    %115 = vector.broadcast %114 : f32 to vector<8x1024xf32>
    %116 = arith.mulf %115, %113 : vector<8x1024xf32>
    %117 = arith.addf %85, %116 : vector<8x1024xf32>
    %c0_49 = arith.constant 0 : index
    %c7 = arith.constant 7 : index
    %118 = memref.load %arg2[%c0_49, %c7] : memref<2x10xf32, #tpu.memory_space<smem>>
    %119 = vector.broadcast %118 : f32 to vector<8x1024xf32>
    %120 = arith.mulf %119, %1 : vector<8x1024xf32>
    %c1_50 = arith.constant 1 : index
    %c7_51 = arith.constant 7 : index
    %121 = memref.load %arg2[%c1_50, %c7_51] : memref<2x10xf32, #tpu.memory_space<smem>>
    %122 = vector.broadcast %121 : f32 to vector<8x1024xf32>
    %123 = arith.mulf %122, %3 : vector<8x1024xf32>
    %124 = arith.addf %120, %123 : vector<8x1024xf32>
    %c7_52 = arith.constant 7 : index
    %125 = memref.load %arg3[%c7_52] : memref<10xf32, #tpu.memory_space<smem>>
    %126 = vector.broadcast %125 : f32 to vector<8x1024xf32>
    %127 = arith.addf %124, %126 : vector<8x1024xf32>
    %cst_53 = arith.constant 0.000000e+00 : f32
    %128 = vector.broadcast %cst_53 : f32 to vector<8x1024xf32>
    %129 = arith.maximumf %127, %128 : vector<8x1024xf32>
    %c7_54 = arith.constant 7 : index
    %130 = memref.load %arg4[%c7_54] : memref<10xf32, #tpu.memory_space<smem>>
    %131 = vector.broadcast %130 : f32 to vector<8x1024xf32>
    %132 = arith.mulf %131, %129 : vector<8x1024xf32>
    %133 = arith.addf %101, %132 : vector<8x1024xf32>
    %c0_55 = arith.constant 0 : index
    %c8 = arith.constant 8 : index
    %134 = memref.load %arg2[%c0_55, %c8] : memref<2x10xf32, #tpu.memory_space<smem>>
    %135 = vector.broadcast %134 : f32 to vector<8x1024xf32>
    %136 = arith.mulf %135, %1 : vector<8x1024xf32>
    %c1_56 = arith.constant 1 : index
    %c8_57 = arith.constant 8 : index
    %137 = memref.load %arg2[%c1_56, %c8_57] : memref<2x10xf32, #tpu.memory_space<smem>>
    %138 = vector.broadcast %137 : f32 to vector<8x1024xf32>
    %139 = arith.mulf %138, %3 : vector<8x1024xf32>
    %140 = arith.addf %136, %139 : vector<8x1024xf32>
    %c8_58 = arith.constant 8 : index
    %141 = memref.load %arg3[%c8_58] : memref<10xf32, #tpu.memory_space<smem>>
    %142 = vector.broadcast %141 : f32 to vector<8x1024xf32>
    %143 = arith.addf %140, %142 : vector<8x1024xf32>
    %cst_59 = arith.constant 0.000000e+00 : f32
    %144 = vector.broadcast %cst_59 : f32 to vector<8x1024xf32>
    %145 = arith.maximumf %143, %144 : vector<8x1024xf32>
    %c8_60 = arith.constant 8 : index
    %146 = memref.load %arg4[%c8_60] : memref<10xf32, #tpu.memory_space<smem>>
    %147 = vector.broadcast %146 : f32 to vector<8x1024xf32>
    %148 = arith.mulf %147, %145 : vector<8x1024xf32>
    %149 = arith.addf %117, %148 : vector<8x1024xf32>
    %c0_61 = arith.constant 0 : index
    %c9 = arith.constant 9 : index
    %150 = memref.load %arg2[%c0_61, %c9] : memref<2x10xf32, #tpu.memory_space<smem>>
    %151 = vector.broadcast %150 : f32 to vector<8x1024xf32>
    %152 = arith.mulf %151, %1 : vector<8x1024xf32>
    %c1_62 = arith.constant 1 : index
    %c9_63 = arith.constant 9 : index
    %153 = memref.load %arg2[%c1_62, %c9_63] : memref<2x10xf32, #tpu.memory_space<smem>>
    %154 = vector.broadcast %153 : f32 to vector<8x1024xf32>
    %155 = arith.mulf %154, %3 : vector<8x1024xf32>
    %156 = arith.addf %152, %155 : vector<8x1024xf32>
    %c9_64 = arith.constant 9 : index
    %157 = memref.load %arg3[%c9_64] : memref<10xf32, #tpu.memory_space<smem>>
    %158 = vector.broadcast %157 : f32 to vector<8x1024xf32>
    %159 = arith.addf %156, %158 : vector<8x1024xf32>
    %cst_65 = arith.constant 0.000000e+00 : f32
    %160 = vector.broadcast %cst_65 : f32 to vector<8x1024xf32>
    %161 = arith.maximumf %159, %160 : vector<8x1024xf32>
    %c9_66 = arith.constant 9 : index
    %162 = memref.load %arg4[%c9_66] : memref<10xf32, #tpu.memory_space<smem>>
    %163 = vector.broadcast %162 : f32 to vector<8x1024xf32>
    %164 = arith.mulf %163, %161 : vector<8x1024xf32>
    %165 = arith.addf %133, %164 : vector<8x1024xf32>
    %166 = arith.addf %149, %165 : vector<8x1024xf32>
    %c0_67 = arith.constant 0 : index
    %167 = memref.load %arg5[%c0_67] : memref<1xf32, #tpu.memory_space<smem>>
    %168 = vector.broadcast %167 : f32 to vector<8x1024xf32>
    %169 = arith.addf %166, %168 : vector<8x1024xf32>
    %cst_68 = arith.constant 5.000000e-01 : f32
    %170 = vector.broadcast %cst_68 : f32 to vector<8x1024xf32>
    %171 = arith.mulf %170, %169 : vector<8x1024xf32>
    %172 = math.tanh %171 : vector<8x1024xf32>
    %cst_69 = arith.constant 5.000000e-01 : f32
    %173 = vector.broadcast %cst_69 : f32 to vector<8x1024xf32>
    %174 = arith.mulf %173, %172 : vector<8x1024xf32>
    %cst_70 = arith.constant 5.000000e-01 : f32
    %175 = vector.broadcast %cst_70 : f32 to vector<8x1024xf32>
    %176 = arith.addf %174, %175 : vector<8x1024xf32>
    %c0_71 = arith.constant 0 : index
    %c0_72 = arith.constant 0 : index
    %177 = vector.load %arg6[%c0_71, %c0_72] : memref<8x1024xf32, #tpu.memory_space<vmem>>, vector<8x1024xf32>
    tpu.vector_store %arg6[%c0_71, %c0_72], %176 {strides = array<i32>} : memref<8x1024xf32, #tpu.memory_space<vmem>>, vector<8x1024xf32>,
    return
  }
  func.func @transform_0(%arg0: i32) -> (i32, i32, i32) {
    %c0_i32 = arith.constant 0 : i32
    %c0_i32_0 = arith.constant 0 : i32
    %c0_i32_1 = arith.constant 0 : i32
    return %c0_i32, %arg0, %c0_i32_0 : i32, i32, i32
  }
  func.func @transform_1(%arg0: i32) -> (i32, i32) {
    %c0_i32 = arith.constant 0 : i32
    %c0_i32_0 = arith.constant 0 : i32
    %c0_i32_1 = arith.constant 0 : i32
    return %c0_i32, %c0_i32_0 : i32, i32
  }
  func.func @transform_2(%arg0: i32) -> i32 {
    %c0_i32 = arith.constant 0 : i32
    %c0_i32_0 = arith.constant 0 : i32
    return %c0_i32 : i32
  }
  func.func @transform_3(%arg0: i32) -> i32 {
    %c0_i32 = arith.constant 0 : i32
    %c0_i32_0 = arith.constant 0 : i32
    return %c0_i32 : i32
  }
  func.func @transform_4(%arg0: i32) -> i32 {
    %c0_i32 = arith.constant 0 : i32
    %c0_i32_0 = arith.constant 0 : i32
    return %c0_i32 : i32
  }
  func.func @transform_5(%arg0: i32) -> (i32, i32) {
    %c0_i32 = arith.constant 0 : i32
    %c0_i32_0 = arith.constant 0 : i32
    return %arg0, %c0_i32 : i32, i32
  }
}

</mosaic_0001>

<bundles_post_ra>
// kernel: tpu_custom_call.1
= control target key start
LH: loop header
LB: loop body
LE: loop exit
PB: predicated region body
PF: predicated region fallthrough
CT: control target
= control target key end

     0   :  { %11 = vsyncpa [#allocation4], 0  ;;  %s1577_s0 = inlined_call_operand.hbm [shape: f32[2,8,1024], index: 0, kind: input, shape index: {}]   ;;  %s1578_s1 = inlined_call_operand.vmem [shape: f32[2,10], index: 1, kind: input, shape index: {}]   ;;  %s1579_s2 = inlined_call_operand.vmem [shape: f32[10], index: 2, kind: input, shape index: {}]   ;;  %s1580_s3 = inlined_call_operand.vmem [shape: f32[10], index: 3, kind: input, shape index: {}]   ;;  %s1581_s4 = inlined_call_operand.<no memory space> [shape: f32[1], index: 4, kind: input, shape index: {}]   ;;  %s1582_s5 = inlined_call_operand.hbm [shape: f32[8,1024], index: 5, kind: output, shape index: {}]  }
   0x1   :  { %12 = vsyncpa [#allocation6], 0 }
   0x2   :  { %13 = vsyncpa [#allocation9], 0  ;;  %s43_s20 = sshll.u32 %s1579_s2, 4  ;;  %s44_s20 = int_to_ptr.vmem [resolvable:$true] %s43_s20 }
   0x3   :  { %14 = vsyncpa [#allocation5], 0  ;;  %s880_s21 = scalar_lea.vmem %s44_s20, 16  ;;  %p885_p1 = scmp.lt.s32.totalorder %s44_s20, %s44_s20 }
   0x4   :  { %p881_p0 = scmp.ne.s32.totalorder %s44_s20, %s880_s21  ;;  %p886_p2 = scmp.lt.s32.totalorder %s880_s21, %s880_s21 }
   0x6   :  { %p887_p3 = por %p886_p2, %p885_p1 }
   0x8   :  { %p888_p4 = pnand %p887_p3, %p881_p0 }
   0xa   :  { %891 = shalt.err (!%p888_p4)
}
   0xb   :  { %s964_s22 = smov [#allocation8]   ;;  %s965_s23 = smov [#allocation3]  }
   0xc   :  { %46 = dma.vmem_to_smem %s44_s20, 16, %s964_s22, [#allocation9]  }
   0xd   :  { %s20_s24 = sshll.u32 %s965_s23, 4  ;;  %s21_s24 = int_to_ptr.vmem [resolvable:$true] %s20_s24 }
   0xe   :  { %s900_s25 = scalar_lea.vmem %s21_s24, 2048  ;;  %p905_p6 = scmp.lt.s32.totalorder %s21_s24, %s21_s24 }
   0xf   :  { %p901_p5 = scmp.ne.s32.totalorder %s21_s24, %s900_s25  ;;  %p906_p7 = scmp.lt.s32.totalorder %s900_s25, %s900_s25 }
  0x11   :  { %p907_p8 = por %p906_p7, %p905_p6 }
  0x13   :  { %p908_p9 = pnand %p907_p8, %p901_p5 }
  0x15   :  { %911 = shalt.err (!%p908_p9)
}
  0x16   :  { %s966_s2 = smov 1024   ;;  %s967_s26 = smov 64  }
  0x17   :  { %26 = dma.hbm_to_vmem [thread:$0]  %s1577_s0, 2048, %s21_s24, [#allocation4], %s966_s2, %s966_s2, %s967_s26  }
  0x18   :  { %s33_s6 = sshll.u32 %s1578_s1, 4  ;;  %s53_s9 = sshll.u32 %s1580_s3, 4  ;;  %s34_s6 = int_to_ptr.vmem [resolvable:$true] %s33_s6  ;;  %s54_s9 = int_to_ptr.vmem [resolvable:$true] %s53_s9 }
  0x19   :  { %s912_s10 = scalar_lea.vmem %s34_s6, 32  ;;  %p917_p11 = scmp.lt.s32.totalorder %s34_s6, %s34_s6 }
  0x1a   :  { %p913_p10 = scmp.ne.s32.totalorder %s34_s6, %s912_s10  ;;  %p918_p12 = scmp.lt.s32.totalorder %s912_s10, %s912_s10 }
  0x1c   :  { %p919_p13 = por %p918_p12, %p917_p11 }
  0x1e   :  { %p920_p0 = pnand %p919_p13, %p913_p10 }
  0x20   :  { %923 = shalt.err (!%p920_p0)
}
  0x21   :  { %s968_s11 = smov [#allocation7]   ;;  %s924_s0 = scalar_lea.vmem %s54_s9, 16 }
  0x22   :  { %36 = dma.vmem_to_smem %s34_s6, 32, %s968_s11, [#allocation6]  }
  0x23   :  { %p925_p1 = scmp.ne.s32.totalorder %s54_s9, %s924_s0  ;;  %p929_p2 = scmp.lt.s32.totalorder %s54_s9, %s54_s9 }
  0x24   :  { %p930_p3 = scmp.lt.s32.totalorder %s924_s0, %s924_s0 }
  0x26   :  { %p931_p4 = por %p930_p3, %p929_p2 }
  0x28   :  { %p932_p5 = pnand %p931_p4, %p925_p1 }
  0x2a   :  { %935 = shalt.err (!%p932_p5)
}
  0x2b   :  { %s969_s1 = smov [#allocation10]  }
  0x2c   :  { %56 = dma.vmem_to_smem %s54_s9, 16, %s969_s1, [#allocation9]  }
  0x2d   :  { %956 = dma.done.wait [#allocation4], 2048  }
  0x2e   :  { %957 = vsyncadd [#allocation4], 4294965248 }
  0x2f   :  { %958 = dma.done.wait [#allocation6], 32  }
  0x30   :  { %959 = vsyncadd [#allocation6], 4294967264 }
  0x31   :  { %960 = dma.done.wait [#allocation9], 32  }
  0x32   :  { %961 = vsyncadd [#allocation9], 4294967264 }
  0x33   :  { %71 = sfence }
  0x34   :  { %s89_s3 = sld [smem:[#allocation7]]  ;;  %v1013_v0 = vld [vmem:[#allocation3] sm:$0xff]  ;;  %v1015_v1 = vld [vmem:[#allocation3 + $0x8] sm:$0xff]  ;;  %v1017_v2 = vld [vmem:[#allocation3 + $0x10] sm:$0xff] }
  0x35   :  { %s804_s12 = sld [smem:[#allocation7 + $0x80]]  ;;  %v1019_v3 = vld [vmem:[#allocation3 + $0x18] sm:$0xff]  ;;  %v1021_v4 = vld [vmem:[#allocation3 + $0x20] sm:$0xff]  ;;  %v1023_v5 = vld [vmem:[#allocation3 + $0x28] sm:$0xff] }
  0x36   :  { %s117_s13 = sld [smem:[#allocation8]]  ;;  %v1025_v6 = vld [vmem:[#allocation3 + $0x30] sm:$0xff]  ;;  %v1027_v7 = vld [vmem:[#allocation3 + $0x38] sm:$0xff]  ;;  %v1029_v8 = vld [vmem:[#allocation3 + $0x40] sm:$0xff] }
  0x37   :  { %s135_s14 = sld [smem:[#allocation10]]  ;;  %v1031_v9 = vld [vmem:[#allocation3 + $0x48] sm:$0xff]  ;;  %v1033_v11 = vld [vmem:[#allocation3 + $0x50] sm:$0xff]  ;;  %v1035_v12 = vld [vmem:[#allocation3 + $0x58] sm:$0xff] }
  0x38   :  { %v1037_v13 = vld [vmem:[#allocation3 + $0x60] sm:$0xff]  ;;  %v1042_v17 = vld [vmem:[#allocation3 + $0x68] sm:$0xff]  ;;  %v1044_v18 = vld [vmem:[#allocation3 + $0x70] sm:$0xff]  ;;  %s1053_s15 = sld [smem:[#allocation7 + $0x1]] }
  0x39   :  { %v1046_v19 = vld [vmem:[#allocation3 + $0x78] sm:$0xff]  ;;  %s1059_s16 = sld [smem:[#allocation7 + $0x81]] }
  0x3a   :  { %v90_v10 = vstv %s89_s3  ;;  %s1065_s17 = sld [smem:[#allocation8 + $0x1]] }
  0x3b   :  { %v91_v14 = vmul.f32 %v90_v10, %v1013_v0  ;;  %v92_v15 = vmul.f32 %v90_v10, %v1015_v1  ;;  %v93_v16 = vmul.f32 %v90_v10, %v1017_v2  ;;  %v94_v20 = vmul.f32 %v90_v10, %v1019_v3  ;;  %s1067_s18 = sld [smem:[#allocation10 + $0x1]] }
  0x3c   :  { %v95_v21 = vmul.f32 %v90_v10, %v1021_v4  ;;  %v96_v22 = vmul.f32 %v90_v10, %v1023_v5  ;;  %v97_v23 = vmul.f32 %v90_v10, %v1025_v6  ;;  %v98_v24 = vmul.f32 %v90_v10, %v1027_v7  ;;  %s1097_s19 = sld [smem:[#allocation7 + $0x2]] }
  0x3d   :  { %v100_v25 = vstv %s804_s12  ;;  %v118_v26 = vstv %s117_s13  ;;  %v136_v27 = vstv %s135_s14  ;;  %s1103_s20 = sld [smem:[#allocation7 + $0x82]] }
  0x3e   :  { %v101_v28 = vmul.f32 %v100_v25, %v1029_v8  ;;  %v102_v29 = vmul.f32 %v100_v25, %v1031_v9  ;;  %v103_v30 = vmul.f32 %v100_v25, %v1033_v11  ;;  %v104_v31 = vmul.f32 %v100_v25, %v1035_v12  ;;  %s1109_s21 = sld [smem:[#allocation8 + $0x2]] }
  0x3f   :  { %v105_v32 = vmul.f32 %v100_v25, %v1037_v13  ;;  %v106_v33 = vmul.f32 %v100_v25, %v1042_v17  ;;  %v107_v34 = vmul.f32 %v100_v25, %v1044_v18  ;;  %v108_v35 = vmul.f32 %v100_v25, %v1046_v19  ;;  %s1111_s22 = sld [smem:[#allocation10 + $0x2]] }
  0x40   :  { %v109_v36 = vadd.f32 %v101_v28, %v91_v14  ;;  %v110_v37 = vadd.f32 %v102_v29, %v92_v15  ;;  %v111_v38 = vadd.f32 %v103_v30, %v93_v16  ;;  %v112_v39 = vadd.f32 %v104_v31, %v94_v20  ;;  %s1149_s23 = sld [smem:[#allocation7 + $0x3]] }
  0x41   :  { %v113_v40 = vadd.f32 %v105_v32, %v95_v21  ;;  %v114_v41 = vadd.f32 %v106_v33, %v96_v22  ;;  %v115_v42 = vadd.f32 %v107_v34, %v97_v23  ;;  %v116_v43 = vadd.f32 %v108_v35, %v98_v24  ;;  %s1151_s24 = sld [smem:[#allocation7 + $0x83]] }
  0x42   :  { %v119_v44 = vadd.f32 %v118_v26, %v109_v36  ;;  %v120_v45 = vadd.f32 %v118_v26, %v110_v37  ;;  %v121_v46 = vadd.f32 %v118_v26, %v111_v38  ;;  %v122_v47 = vadd.f32 %v118_v26, %v112_v39  ;;  %s1153_s25 = sld [smem:[#allocation8 + $0x3]] }
  0x43   :  { %v123_v48 = vadd.f32 %v118_v26, %v113_v40  ;;  %v124_v49 = vadd.f32 %v118_v26, %v114_v41  ;;  %v125_v50 = vadd.f32 %v118_v26, %v115_v42  ;;  %v126_v51 = vadd.f32 %v118_v26, %v116_v43  ;;  %s1155_s2 = sld [smem:[#allocation10 + $0x3]] }
  0x44   :  { %v127_v52 = vmax.f32 %v119_v44, 0.0  ;;  %v128_v53 = vmax.f32 %v120_v45, 0.0  ;;  %v129_v54 = vmax.f32 %v121_v46, 0.0  ;;  %v130_v55 = vmax.f32 %v122_v47, 0.0  ;;  %s1201_s26 = sld [smem:[#allocation7 + $0x4]] }
  0x45   :  { %v131_v56 = vmax.f32 %v123_v48, 0.0  ;;  %v132_v57 = vmax.f32 %v124_v49, 0.0  ;;  %v133_v58 = vmax.f32 %v125_v50, 0.0  ;;  %v134_v59 = vmax.f32 %v126_v51, 0.0  ;;  %s1203_s27 = sld [smem:[#allocation7 + $0x84]] }
  0x46   :  { %v1069_v60 = vmul.f32 %v136_v27, %v127_v52  ;;  %v1071_v61 = vmul.f32 %v136_v27, %v128_v53  ;;  %v1073_v62 = vmul.f32 %v136_v27, %v129_v54  ;;  %v1075_v63 = vmul.f32 %v136_v27, %v130_v55  ;;  %s1205_s28 = sld [smem:[#allocation8 + $0x4]] }
  0x47   :  { %v1077_v10 = vmul.f32 %v136_v27, %v131_v56  ;;  %v1079_v14 = vmul.f32 %v136_v27, %v132_v57  ;;  %v1081_v15 = vmul.f32 %v136_v27, %v133_v58  ;;  %v1083_v16 = vmul.f32 %v136_v27, %v134_v59  ;;  %s1207_s29 = sld [smem:[#allocation10 + $0x4]] }
  0x48   :  { %v154_v20 = vstv %s1053_s15  ;;  %v164_v21 = vstv %s1059_s16  ;;  %v182_v22 = vstv %s1065_s17  ;;  %v200_v23 = vstv %s1067_s18  ;;  %s1253_s30 = sld [smem:[#allocation7 + $0x5]] }
  0x49   :  { %v155_v24 = vmul.f32 %v154_v20, %v1013_v0  ;;  %v156_v25 = vmul.f32 %v154_v20, %v1015_v1  ;;  %v157_v26 = vmul.f32 %v154_v20, %v1017_v2  ;;  %v158_v28 = vmul.f32 %v154_v20, %v1019_v3  ;;  %s1255_s6 = sld [smem:[#allocation7 + $0x85]] }
  0x4a   :  { %v159_v29 = vmul.f32 %v154_v20, %v1021_v4  ;;  %v160_v30 = vmul.f32 %v154_v20, %v1023_v5  ;;  %v161_v31 = vmul.f32 %v154_v20, %v1025_v6  ;;  %v162_v27 = vmul.f32 %v154_v20, %v1027_v7  ;;  %s1257_s7 = sld [smem:[#allocation8 + $0x5]] }
  0x4b   :  { %v165_v32 = vmul.f32 %v164_v21, %v1029_v8  ;;  %v166_v33 = vmul.f32 %v164_v21, %v1031_v9  ;;  %v167_v34 = vmul.f32 %v164_v21, %v1033_v11  ;;  %v168_v35 = vmul.f32 %v164_v21, %v1035_v12  ;;  %s1259_s8 = sld [smem:[#allocation10 + $0x5]] }
  0x4c   :  { %v169_v36 = vmul.f32 %v164_v21, %v1037_v13  ;;  %v170_v37 = vmul.f32 %v164_v21, %v1042_v17  ;;  %v171_v38 = vmul.f32 %v164_v21, %v1044_v18  ;;  %v172_v39 = vmul.f32 %v164_v21, %v1046_v19  ;;  %s1305_s9 = sld [smem:[#allocation7 + $0x6]] }
  0x4d   :  { %v173_v40 = vadd.f32 %v165_v32, %v155_v24  ;;  %v174_v41 = vadd.f32 %v166_v33, %v156_v25  ;;  %v175_v42 = vadd.f32 %v167_v34, %v157_v26  ;;  %v176_v43 = vadd.f32 %v168_v35, %v158_v28  ;;  %s1307_s10 = sld [smem:[#allocation7 + $0x86]] }
  0x4e   :  { %v177_v44 = vadd.f32 %v169_v36, %v159_v29  ;;  %v178_v45 = vadd.f32 %v170_v37, %v160_v30  ;;  %v179_v46 = vadd.f32 %v171_v38, %v161_v31  ;;  %v180_v47 = vadd.f32 %v172_v39, %v162_v27  ;;  %s1309_s11 = sld [smem:[#allocation8 + $0x6]] }
  0x4f   :  { %v183_v48 = vadd.f32 %v182_v22, %v173_v40  ;;  %v184_v49 = vadd.f32 %v182_v22, %v174_v41  ;;  %v185_v50 = vadd.f32 %v182_v22, %v175_v42  ;;  %v186_v51 = vadd.f32 %v182_v22, %v176_v43  ;;  %s1311_s0 = sld [smem:[#allocation10 + $0x6]] }
  0x50   :  { %v187_v52 = vadd.f32 %v182_v22, %v177_v44  ;;  %v188_v53 = vadd.f32 %v182_v22, %v178_v45  ;;  %v189_v54 = vadd.f32 %v182_v22, %v179_v46  ;;  %v190_v55 = vadd.f32 %v182_v22, %v180_v47  ;;  %s1357_s1 = sld [smem:[#allocation7 + $0x7]] }
  0x51   :  { %v191_v56 = vmax.f32 %v183_v48, 0.0  ;;  %v192_v57 = vmax.f32 %v184_v49, 0.0  ;;  %v193_v58 = vmax.f32 %v185_v50, 0.0  ;;  %v194_v59 = vmax.f32 %v186_v51, 0.0  ;;  %s1359_s3 = sld [smem:[#allocation7 + $0x87]] }
  0x52   :  { %v195_v20 = vmax.f32 %v187_v52, 0.0  ;;  %v196_v21 = vmax.f32 %v188_v53, 0.0  ;;  %v197_v24 = vmax.f32 %v189_v54, 0.0  ;;  %v198_v25 = vmax.f32 %v190_v55, 0.0  ;;  %s1361_s12 = sld [smem:[#allocation8 + $0x7]] }
  0x53   :  { %v1113_v26 = vmul.f32 %v200_v23, %v191_v56  ;;  %v1115_v28 = vmul.f32 %v200_v23, %v192_v57  ;;  %v1117_v29 = vmul.f32 %v200_v23, %v193_v58  ;;  %v1119_v30 = vmul.f32 %v200_v23, %v194_v59  ;;  %s1363_s13 = sld [smem:[#allocation10 + $0x7]] }
  0x54   :  { %v1121_v22 = vmul.f32 %v200_v23, %v195_v20  ;;  %v1123_v31 = vmul.f32 %v200_v23, %v196_v21  ;;  %v1125_v27 = vmul.f32 %v200_v23, %v197_v24  ;;  %v1127_v32 = vmul.f32 %v200_v23, %v198_v25  ;;  %s1409_s14 = sld [smem:[#allocation7 + $0x8]] }
  0x55   :  { %v218_v33 = vstv %s1097_s19  ;;  %v228_v34 = vstv %s1103_s20  ;;  %v246_v35 = vstv %s1109_s21  ;;  %v264_v36 = vstv %s1111_s22  ;;  %s1411_s15 = sld [smem:[#allocation7 + $0x88]] }
  0x56   :  { %v219_v37 = vmul.f32 %v218_v33, %v1013_v0  ;;  %v220_v38 = vmul.f32 %v218_v33, %v1015_v1  ;;  %v221_v39 = vmul.f32 %v218_v33, %v1017_v2  ;;  %v222_v40 = vmul.f32 %v218_v33, %v1019_v3  ;;  %s1413_s16 = sld [smem:[#allocation8 + $0x8]] }
  0x57   :  { %v223_v41 = vmul.f32 %v218_v33, %v1021_v4  ;;  %v224_v42 = vmul.f32 %v218_v33, %v1023_v5  ;;  %v225_v43 = vmul.f32 %v218_v33, %v1025_v6  ;;  %v226_v23 = vmul.f32 %v218_v33, %v1027_v7  ;;  %s1415_s17 = sld [smem:[#allocation10 + $0x8]] }
  0x58   :  { %v229_v44 = vmul.f32 %v228_v34, %v1029_v8  ;;  %v230_v45 = vmul.f32 %v228_v34, %v1031_v9  ;;  %v231_v46 = vmul.f32 %v228_v34, %v1033_v11  ;;  %v232_v47 = vmul.f32 %v228_v34, %v1035_v12  ;;  %s1495_s18 = sld [smem:[#allocation7 + $0x9]] }
  0x59   :  { %v233_v48 = vmul.f32 %v228_v34, %v1037_v13  ;;  %v234_v49 = vmul.f32 %v228_v34, %v1042_v17  ;;  %v235_v50 = vmul.f32 %v228_v34, %v1044_v18  ;;  %v236_v51 = vmul.f32 %v228_v34, %v1046_v19  ;;  %s1497_s19 = sld [smem:[#allocation7 + $0x89]] }
  0x5a   :  { %v237_v52 = vadd.f32 %v229_v44, %v219_v37  ;;  %v238_v53 = vadd.f32 %v230_v45, %v220_v38  ;;  %v239_v54 = vadd.f32 %v231_v46, %v221_v39  ;;  %v240_v55 = vadd.f32 %v232_v47, %v222_v40  ;;  %s1499_s20 = sld [smem:[#allocation8 + $0x9]] }
  0x5b   :  { %v241_v56 = vadd.f32 %v233_v48, %v223_v41  ;;  %v242_v57 = vadd.f32 %v234_v49, %v224_v42  ;;  %v243_v58 = vadd.f32 %v235_v50, %v225_v43  ;;  %v244_v59 = vadd.f32 %v236_v51, %v226_v23  ;;  %s1501_s21 = sld [smem:[#allocation10 + $0x9]] }
  0x5c   :  { %v247_v20 = vadd.f32 %v246_v35, %v237_v52  ;;  %v248_v21 = vadd.f32 %v246_v35, %v238_v53  ;;  %v249_v24 = vadd.f32 %v246_v35, %v239_v54  ;;  %v250_v25 = vadd.f32 %v246_v35, %v240_v55 }
  0x5d   :  { %v251_v33 = vadd.f32 %v246_v35, %v241_v56  ;;  %v252_v34 = vadd.f32 %v246_v35, %v242_v57  ;;  %v253_v37 = vadd.f32 %v246_v35, %v243_v58  ;;  %v254_v38 = vadd.f32 %v246_v35, %v244_v59 }
  0x5e   :  { %v255_v39 = vmax.f32 %v247_v20, 0.0  ;;  %v256_v40 = vmax.f32 %v248_v21, 0.0  ;;  %v257_v44 = vmax.f32 %v249_v24, 0.0  ;;  %v258_v45 = vmax.f32 %v250_v25, 0.0 }
  0x5f   :  { %v259_v41 = vmax.f32 %v251_v33, 0.0  ;;  %v260_v42 = vmax.f32 %v252_v34, 0.0  ;;  %v261_v43 = vmax.f32 %v253_v37, 0.0  ;;  %v262_v23 = vmax.f32 %v254_v38, 0.0 }
  0x60   :  { %v265_v46 = vmul.f32 %v264_v36, %v255_v39  ;;  %v266_v47 = vmul.f32 %v264_v36, %v256_v40  ;;  %v267_v48 = vmul.f32 %v264_v36, %v257_v44  ;;  %v268_v49 = vmul.f32 %v264_v36, %v258_v45 }
  0x61   :  { %v269_v50 = vmul.f32 %v264_v36, %v259_v41  ;;  %v270_v51 = vmul.f32 %v264_v36, %v260_v42  ;;  %v271_v52 = vmul.f32 %v264_v36, %v261_v43  ;;  %v272_v35 = vmul.f32 %v264_v36, %v262_v23 }
  0x62   :  { %v1158_v53 = vadd.f32 %v265_v46, %v1069_v60  ;;  %v1161_v54 = vadd.f32 %v266_v47, %v1071_v61  ;;  %v1164_v55 = vadd.f32 %v267_v48, %v1073_v62  ;;  %v1167_v56 = vadd.f32 %v268_v49, %v1075_v63 }
  0x63   :  { %v1170_v57 = vadd.f32 %v269_v50, %v1077_v10  ;;  %v1173_v58 = vadd.f32 %v270_v51, %v1079_v14  ;;  %v1176_v36 = vadd.f32 %v271_v52, %v1081_v15  ;;  %v1179_v60 = vadd.f32 %v272_v35, %v1083_v16 }
  0x64   :  { %v282_v61 = vstv %s1149_s23  ;;  %v292_v59 = vstv %s1151_s24  ;;  %v310_v20 = vstv %s1153_s25  ;;  %v328_v62 = vstv %s1155_s2 }
  0x65   :  { %v283_v21 = vmul.f32 %v282_v61, %v1013_v0  ;;  %v284_v63 = vmul.f32 %v282_v61, %v1015_v1  ;;  %v285_v10 = vmul.f32 %v282_v61, %v1017_v2  ;;  %v286_v24 = vmul.f32 %v282_v61, %v1019_v3 }
  0x66   :  { %v287_v14 = vmul.f32 %v282_v61, %v1021_v4  ;;  %v288_v15 = vmul.f32 %v282_v61, %v1023_v5  ;;  %v289_v25 = vmul.f32 %v282_v61, %v1025_v6  ;;  %v290_v16 = vmul.f32 %v282_v61, %v1027_v7 }
  0x67   :  { %v293_v33 = vmul.f32 %v292_v59, %v1029_v8  ;;  %v294_v34 = vmul.f32 %v292_v59, %v1031_v9  ;;  %v295_v37 = vmul.f32 %v292_v59, %v1033_v11  ;;  %v296_v38 = vmul.f32 %v292_v59, %v1035_v12 }
  0x68   :  { %v297_v39 = vmul.f32 %v292_v59, %v1037_v13  ;;  %v298_v40 = vmul.f32 %v292_v59, %v1042_v17  ;;  %v299_v44 = vmul.f32 %v292_v59, %v1044_v18  ;;  %v300_v45 = vmul.f32 %v292_v59, %v1046_v19 }
  0x69   :  { %v301_v41 = vadd.f32 %v293_v33, %v283_v21  ;;  %v302_v42 = vadd.f32 %v294_v34, %v284_v63  ;;  %v303_v43 = vadd.f32 %v295_v37, %v285_v10  ;;  %v304_v23 = vadd.f32 %v296_v38, %v286_v24 }
  0x6a   :  { %v305_v46 = vadd.f32 %v297_v39, %v287_v14  ;;  %v306_v47 = vadd.f32 %v298_v40, %v288_v15  ;;  %v307_v48 = vadd.f32 %v299_v44, %v289_v25  ;;  %v308_v49 = vadd.f32 %v300_v45, %v290_v16 }
  0x6b   :  { %v311_v50 = vadd.f32 %v310_v20, %v301_v41  ;;  %v312_v51 = vadd.f32 %v310_v20, %v302_v42  ;;  %v313_v52 = vadd.f32 %v310_v20, %v303_v43  ;;  %v314_v35 = vadd.f32 %v310_v20, %v304_v23 }
  0x6c   :  { %v315_v61 = vadd.f32 %v310_v20, %v305_v46  ;;  %v316_v59 = vadd.f32 %v310_v20, %v306_v47  ;;  %v317_v21 = vadd.f32 %v310_v20, %v307_v48  ;;  %v318_v63 = vadd.f32 %v310_v20, %v308_v49 }
  0x6d   :  { %v319_v10 = vmax.f32 %v311_v50, 0.0  ;;  %v320_v24 = vmax.f32 %v312_v51, 0.0  ;;  %v321_v33 = vmax.f32 %v313_v52, 0.0  ;;  %v322_v34 = vmax.f32 %v314_v35, 0.0 }
  0x6e   :  { %v323_v14 = vmax.f32 %v315_v61, 0.0  ;;  %v324_v15 = vmax.f32 %v316_v59, 0.0  ;;  %v325_v25 = vmax.f32 %v317_v21, 0.0  ;;  %v326_v16 = vmax.f32 %v318_v63, 0.0 }
  0x6f   :  { %v329_v37 = vmul.f32 %v328_v62, %v319_v10  ;;  %v330_v38 = vmul.f32 %v328_v62, %v320_v24  ;;  %v331_v39 = vmul.f32 %v328_v62, %v321_v33  ;;  %v332_v40 = vmul.f32 %v328_v62, %v322_v34 }
  0x70   :  { %v333_v44 = vmul.f32 %v328_v62, %v323_v14  ;;  %v334_v45 = vmul.f32 %v328_v62, %v324_v15  ;;  %v335_v41 = vmul.f32 %v328_v62, %v325_v25  ;;  %v336_v20 = vmul.f32 %v328_v62, %v326_v16 }
  0x71   :  { %v1210_v42 = vadd.f32 %v329_v37, %v1113_v26  ;;  %v1213_v43 = vadd.f32 %v330_v38, %v1115_v28  ;;  %v1216_v23 = vadd.f32 %v331_v39, %v1117_v29  ;;  %v1219_v46 = vadd.f32 %v332_v40, %v1119_v30 }
  0x72   :  { %v1222_v47 = vadd.f32 %v333_v44, %v1121_v22  ;;  %v1225_v48 = vadd.f32 %v334_v45, %v1123_v31  ;;  %v1228_v62 = vadd.f32 %v335_v41, %v1125_v27  ;;  %v1231_v26 = vadd.f32 %v336_v20, %v1127_v32 }
  0x73   :  { %v346_v28 = vstv %s1201_s26  ;;  %v356_v49 = vstv %s1203_s27  ;;  %v374_v50 = vstv %s1205_s28  ;;  %v392_v29 = vstv %s1207_s29 }
  0x74   :  { %v347_v51 = vmul.f32 %v346_v28, %v1013_v0  ;;  %v348_v30 = vmul.f32 %v346_v28, %v1015_v1  ;;  %v349_v22 = vmul.f32 %v346_v28, %v1017_v2  ;;  %v350_v52 = vmul.f32 %v346_v28, %v1019_v3 }
  0x75   :  { %v351_v31 = vmul.f32 %v346_v28, %v1021_v4  ;;  %v352_v27 = vmul.f32 %v346_v28, %v1023_v5  ;;  %v353_v35 = vmul.f32 %v346_v28, %v1025_v6  ;;  %v354_v32 = vmul.f32 %v346_v28, %v1027_v7 }
  0x76   :  { %v357_v61 = vmul.f32 %v356_v49, %v1029_v8  ;;  %v358_v59 = vmul.f32 %v356_v49, %v1031_v9  ;;  %v359_v21 = vmul.f32 %v356_v49, %v1033_v11  ;;  %v360_v63 = vmul.f32 %v356_v49, %v1035_v12 }
  0x77   :  { %v361_v10 = vmul.f32 %v356_v49, %v1037_v13  ;;  %v362_v24 = vmul.f32 %v356_v49, %v1042_v17  ;;  %v363_v33 = vmul.f32 %v356_v49, %v1044_v18  ;;  %v364_v34 = vmul.f32 %v356_v49, %v1046_v19 }
  0x78   :  { %v365_v14 = vadd.f32 %v357_v61, %v347_v51  ;;  %v366_v15 = vadd.f32 %v358_v59, %v348_v30  ;;  %v367_v25 = vadd.f32 %v359_v21, %v349_v22  ;;  %v368_v16 = vadd.f32 %v360_v63, %v350_v52 }
  0x79   :  { %v369_v37 = vadd.f32 %v361_v10, %v351_v31  ;;  %v370_v38 = vadd.f32 %v362_v24, %v352_v27  ;;  %v371_v39 = vadd.f32 %v363_v33, %v353_v35  ;;  %v372_v40 = vadd.f32 %v364_v34, %v354_v32 }
  0x7a   :  { %v375_v44 = vadd.f32 %v374_v50, %v365_v14  ;;  %v376_v45 = vadd.f32 %v374_v50, %v366_v15  ;;  %v377_v41 = vadd.f32 %v374_v50, %v367_v25  ;;  %v378_v20 = vadd.f32 %v374_v50, %v368_v16 }
  0x7b   :  { %v379_v28 = vadd.f32 %v374_v50, %v369_v37  ;;  %v380_v49 = vadd.f32 %v374_v50, %v370_v38  ;;  %v381_v51 = vadd.f32 %v374_v50, %v371_v39  ;;  %v382_v30 = vadd.f32 %v374_v50, %v372_v40 }
  0x7c   :  { %v383_v22 = vmax.f32 %v375_v44, 0.0  ;;  %v384_v52 = vmax.f32 %v376_v45, 0.0  ;;  %v385_v61 = vmax.f32 %v377_v41, 0.0  ;;  %v386_v59 = vmax.f32 %v378_v20, 0.0 }
  0x7d   :  { %v387_v31 = vmax.f32 %v379_v28, 0.0  ;;  %v388_v27 = vmax.f32 %v380_v49, 0.0  ;;  %v389_v35 = vmax.f32 %v381_v51, 0.0  ;;  %v390_v32 = vmax.f32 %v382_v30, 0.0 }
  0x7e   :  { %v393_v21 = vmul.f32 %v392_v29, %v383_v22  ;;  %v394_v63 = vmul.f32 %v392_v29, %v384_v52  ;;  %v395_v10 = vmul.f32 %v392_v29, %v385_v61  ;;  %v396_v24 = vmul.f32 %v392_v29, %v386_v59 }
  0x7f   :  { %v397_v33 = vmul.f32 %v392_v29, %v387_v31  ;;  %v398_v34 = vmul.f32 %v392_v29, %v388_v27  ;;  %v399_v14 = vmul.f32 %v392_v29, %v389_v35  ;;  %v400_v50 = vmul.f32 %v392_v29, %v390_v32 }
  0x80   :  { %v1262_v15 = vadd.f32 %v393_v21, %v1158_v53  ;;  %v1265_v25 = vadd.f32 %v394_v63, %v1161_v54  ;;  %v1268_v16 = vadd.f32 %v395_v10, %v1164_v55  ;;  %v1271_v37 = vadd.f32 %v396_v24, %v1167_v56 }
  0x81   :  { %v1274_v38 = vadd.f32 %v397_v33, %v1170_v57  ;;  %v1277_v39 = vadd.f32 %v398_v34, %v1173_v58  ;;  %v1280_v29 = vadd.f32 %v399_v14, %v1176_v36  ;;  %v1283_v53 = vadd.f32 %v400_v50, %v1179_v60 }
  0x82   :  { %v410_v54 = vstv %s1253_s30  ;;  %v420_v40 = vstv %s1255_s6  ;;  %v438_v44 = vstv %s1257_s7  ;;  %v456_v55 = vstv %s1259_s8 }
  0x83   :  { %v411_v45 = vmul.f32 %v410_v54, %v1013_v0  ;;  %v412_v56 = vmul.f32 %v410_v54, %v1015_v1  ;;  %v413_v57 = vmul.f32 %v410_v54, %v1017_v2  ;;  %v414_v41 = vmul.f32 %v410_v54, %v1019_v3 }
  0x84   :  { %v415_v58 = vmul.f32 %v410_v54, %v1021_v4  ;;  %v416_v36 = vmul.f32 %v410_v54, %v1023_v5  ;;  %v417_v20 = vmul.f32 %v410_v54, %v1025_v6  ;;  %v418_v60 = vmul.f32 %v410_v54, %v1027_v7 }
  0x85   :  { %v421_v28 = vmul.f32 %v420_v40, %v1029_v8  ;;  %v422_v49 = vmul.f32 %v420_v40, %v1031_v9  ;;  %v423_v51 = vmul.f32 %v420_v40, %v1033_v11  ;;  %v424_v30 = vmul.f32 %v420_v40, %v1035_v12 }
  0x86   :  { %v425_v22 = vmul.f32 %v420_v40, %v1037_v13  ;;  %v426_v52 = vmul.f32 %v420_v40, %v1042_v17  ;;  %v427_v61 = vmul.f32 %v420_v40, %v1044_v18  ;;  %v428_v59 = vmul.f32 %v420_v40, %v1046_v19 }
  0x87   :  { %v429_v31 = vadd.f32 %v421_v28, %v411_v45  ;;  %v430_v27 = vadd.f32 %v422_v49, %v412_v56  ;;  %v431_v35 = vadd.f32 %v423_v51, %v413_v57  ;;  %v432_v32 = vadd.f32 %v424_v30, %v414_v41 }
  0x88   :  { %v433_v21 = vadd.f32 %v425_v22, %v415_v58  ;;  %v434_v63 = vadd.f32 %v426_v52, %v416_v36  ;;  %v435_v10 = vadd.f32 %v427_v61, %v417_v20  ;;  %v436_v24 = vadd.f32 %v428_v59, %v418_v60 }
  0x89   :  { %v439_v33 = vadd.f32 %v438_v44, %v429_v31  ;;  %v440_v34 = vadd.f32 %v438_v44, %v430_v27  ;;  %v441_v14 = vadd.f32 %v438_v44, %v431_v35  ;;  %v442_v50 = vadd.f32 %v438_v44, %v432_v32 }
  0x8a   :  { %v443_v54 = vadd.f32 %v438_v44, %v433_v21  ;;  %v444_v40 = vadd.f32 %v438_v44, %v434_v63  ;;  %v445_v45 = vadd.f32 %v438_v44, %v435_v10  ;;  %v446_v56 = vadd.f32 %v438_v44, %v436_v24 }
  0x8b   :  { %v447_v57 = vmax.f32 %v439_v33, 0.0  ;;  %v448_v41 = vmax.f32 %v440_v34, 0.0  ;;  %v449_v28 = vmax.f32 %v441_v14, 0.0  ;;  %v450_v49 = vmax.f32 %v442_v50, 0.0 }
  0x8c   :  { %v451_v58 = vmax.f32 %v443_v54, 0.0  ;;  %v452_v36 = vmax.f32 %v444_v40, 0.0  ;;  %v453_v20 = vmax.f32 %v445_v45, 0.0  ;;  %v454_v60 = vmax.f32 %v446_v56, 0.0 }
  0x8d   :  { %v457_v51 = vmul.f32 %v456_v55, %v447_v57  ;;  %v458_v30 = vmul.f32 %v456_v55, %v448_v41  ;;  %v459_v22 = vmul.f32 %v456_v55, %v449_v28  ;;  %v460_v52 = vmul.f32 %v456_v55, %v450_v49 }
  0x8e   :  { %v461_v61 = vmul.f32 %v456_v55, %v451_v58  ;;  %v462_v59 = vmul.f32 %v456_v55, %v452_v36  ;;  %v463_v31 = vmul.f32 %v456_v55, %v453_v20  ;;  %v464_v44 = vmul.f32 %v456_v55, %v454_v60 }
  0x8f   :  { %v1314_v27 = vadd.f32 %v457_v51, %v1210_v42  ;;  %v1317_v35 = vadd.f32 %v458_v30, %v1213_v43  ;;  %v1320_v32 = vadd.f32 %v459_v22, %v1216_v23  ;;  %v1323_v21 = vadd.f32 %v460_v52, %v1219_v46 }
  0x90   :  { %v1326_v63 = vadd.f32 %v461_v61, %v1222_v47  ;;  %v1329_v10 = vadd.f32 %v462_v59, %v1225_v48  ;;  %v1332_v55 = vadd.f32 %v463_v31, %v1228_v62  ;;  %v1335_v42 = vadd.f32 %v464_v44, %v1231_v26 }
  0x91   :  { %v474_v43 = vstv %s1305_s9  ;;  %v484_v24 = vstv %s1307_s10  ;;  %v502_v33 = vstv %s1309_s11  ;;  %v520_v23 = vstv %s1311_s0 }
  0x92   :  { %v475_v34 = vmul.f32 %v474_v43, %v1013_v0  ;;  %v476_v46 = vmul.f32 %v474_v43, %v1015_v1  ;;  %v477_v47 = vmul.f32 %v474_v43, %v1017_v2  ;;  %v478_v14 = vmul.f32 %v474_v43, %v1019_v3 }
  0x93   :  { %v479_v48 = vmul.f32 %v474_v43, %v1021_v4  ;;  %v480_v62 = vmul.f32 %v474_v43, %v1023_v5  ;;  %v481_v50 = vmul.f32 %v474_v43, %v1025_v6  ;;  %v482_v26 = vmul.f32 %v474_v43, %v1027_v7 }
  0x94   :  { %v485_v54 = vmul.f32 %v484_v24, %v1029_v8  ;;  %v486_v40 = vmul.f32 %v484_v24, %v1031_v9  ;;  %v487_v45 = vmul.f32 %v484_v24, %v1033_v11  ;;  %v488_v56 = vmul.f32 %v484_v24, %v1035_v12 }
  0x95   :  { %v489_v57 = vmul.f32 %v484_v24, %v1037_v13  ;;  %v490_v41 = vmul.f32 %v484_v24, %v1042_v17  ;;  %v491_v28 = vmul.f32 %v484_v24, %v1044_v18  ;;  %v492_v49 = vmul.f32 %v484_v24, %v1046_v19 }
  0x96   :  { %v493_v58 = vadd.f32 %v485_v54, %v475_v34  ;;  %v494_v36 = vadd.f32 %v486_v40, %v476_v46  ;;  %v495_v20 = vadd.f32 %v487_v45, %v477_v47  ;;  %v496_v60 = vadd.f32 %v488_v56, %v478_v14 }
  0x97   :  { %v497_v51 = vadd.f32 %v489_v57, %v479_v48  ;;  %v498_v30 = vadd.f32 %v490_v41, %v480_v62  ;;  %v499_v22 = vadd.f32 %v491_v28, %v481_v50  ;;  %v500_v52 = vadd.f32 %v492_v49, %v482_v26 }
  0x98   :  { %v503_v61 = vadd.f32 %v502_v33, %v493_v58  ;;  %v504_v59 = vadd.f32 %v502_v33, %v494_v36  ;;  %v505_v31 = vadd.f32 %v502_v33, %v495_v20  ;;  %v506_v44 = vadd.f32 %v502_v33, %v496_v60 }
  0x99   :  { %v507_v43 = vadd.f32 %v502_v33, %v497_v51  ;;  %v508_v24 = vadd.f32 %v502_v33, %v498_v30  ;;  %v509_v34 = vadd.f32 %v502_v33, %v499_v22  ;;  %v510_v46 = vadd.f32 %v502_v33, %v500_v52 }
  0x9a   :  { %v511_v47 = vmax.f32 %v503_v61, 0.0  ;;  %v512_v14 = vmax.f32 %v504_v59, 0.0  ;;  %v513_v54 = vmax.f32 %v505_v31, 0.0  ;;  %v514_v40 = vmax.f32 %v506_v44, 0.0 }
  0x9b   :  { %v515_v48 = vmax.f32 %v507_v43, 0.0  ;;  %v516_v62 = vmax.f32 %v508_v24, 0.0  ;;  %v517_v50 = vmax.f32 %v509_v34, 0.0  ;;  %v518_v26 = vmax.f32 %v510_v46, 0.0 }
  0x9c   :  { %v521_v45 = vmul.f32 %v520_v23, %v511_v47  ;;  %v522_v56 = vmul.f32 %v520_v23, %v512_v14  ;;  %v523_v57 = vmul.f32 %v520_v23, %v513_v54  ;;  %v524_v41 = vmul.f32 %v520_v23, %v514_v40 }
  0x9d   :  { %v525_v28 = vmul.f32 %v520_v23, %v515_v48  ;;  %v526_v49 = vmul.f32 %v520_v23, %v516_v62  ;;  %v527_v58 = vmul.f32 %v520_v23, %v517_v50  ;;  %v528_v33 = vmul.f32 %v520_v23, %v518_v26 }
  0x9e   :  { %v1366_v36 = vadd.f32 %v521_v45, %v1262_v15  ;;  %v1369_v20 = vadd.f32 %v522_v56, %v1265_v25  ;;  %v1372_v60 = vadd.f32 %v523_v57, %v1268_v16  ;;  %v1375_v51 = vadd.f32 %v524_v41, %v1271_v37 }
  0x9f   :  { %v1378_v30 = vadd.f32 %v525_v28, %v1274_v38  ;;  %v1381_v22 = vadd.f32 %v526_v49, %v1277_v39  ;;  %v1384_v23 = vadd.f32 %v527_v58, %v1280_v29  ;;  %v1387_v15 = vadd.f32 %v528_v33, %v1283_v53 }
  0xa0   :  { %v538_v25 = vstv %s1357_s1  ;;  %v548_v52 = vstv %s1359_s3  ;;  %v566_v61 = vstv %s1361_s12  ;;  %v584_v16 = vstv %s1363_s13 }
  0xa1   :  { %v539_v59 = vmul.f32 %v538_v25, %v1013_v0  ;;  %v540_v37 = vmul.f32 %v538_v25, %v1015_v1  ;;  %v541_v38 = vmul.f32 %v538_v25, %v1017_v2  ;;  %v542_v31 = vmul.f32 %v538_v25, %v1019_v3 }
  0xa2   :  { %v543_v39 = vmul.f32 %v538_v25, %v1021_v4  ;;  %v544_v29 = vmul.f32 %v538_v25, %v1023_v5  ;;  %v545_v44 = vmul.f32 %v538_v25, %v1025_v6  ;;  %v546_v53 = vmul.f32 %v538_v25, %v1027_v7 }
  0xa3   :  { %v549_v43 = vmul.f32 %v548_v52, %v1029_v8  ;;  %v550_v24 = vmul.f32 %v548_v52, %v1031_v9  ;;  %v551_v0 = vmul.f32 %v548_v52, %v1033_v11  ;;  %v552_v1 = vmul.f32 %v548_v52, %v1035_v12 }
  0xa4   :  { %v553_v2 = vmul.f32 %v548_v52, %v1037_v13  ;;  %v554_v3 = vmul.f32 %v548_v52, %v1042_v17  ;;  %v555_v4 = vmul.f32 %v548_v52, %v1044_v18  ;;  %v556_v5 = vmul.f32 %v548_v52, %v1046_v19 }
  0xa5   :  { %v557_v6 = vadd.f32 %v549_v43, %v539_v59  ;;  %v558_v7 = vadd.f32 %v550_v24, %v540_v37  ;;  %v559_v34 = vadd.f32 %v551_v0, %v541_v38  ;;  %v560_v8 = vadd.f32 %v552_v1, %v542_v31  ;;  %v1447_v24 = vld [vmem:[#allocation3] sm:$0xff]  ;;  %v1453_v0 = vld [vmem:[#allocation3 + $0x10] sm:$0xff]  ;;  %v1456_v1 = vld [vmem:[#allocation3 + $0x18] sm:$0xff] }
  0xa6   :  { %v561_v9 = vadd.f32 %v553_v2, %v543_v39  ;;  %v562_v11 = vadd.f32 %v554_v3, %v544_v29  ;;  %v563_v46 = vadd.f32 %v555_v4, %v545_v44  ;;  %v564_v12 = vadd.f32 %v556_v5, %v546_v53  ;;  %v1459_v2 = vld [vmem:[#allocation3 + $0x20] sm:$0xff]  ;;  %v1462_v4 = vld [vmem:[#allocation3 + $0x28] sm:$0xff] }
  0xa7   :  { %v567_v13 = vadd.f32 %v566_v61, %v557_v6  ;;  %v568_v17 = vadd.f32 %v566_v61, %v558_v7  ;;  %v569_v47 = vadd.f32 %v566_v61, %v559_v34  ;;  %v570_v18 = vadd.f32 %v566_v61, %v560_v8  ;;  %v1465_v6 = vld [vmem:[#allocation3 + $0x30] sm:$0xff]  ;;  %v1468_v34 = vld [vmem:[#allocation3 + $0x38] sm:$0xff] }
  0xa8   :  { %v571_v19 = vadd.f32 %v566_v61, %v561_v9  ;;  %v572_v14 = vadd.f32 %v566_v61, %v562_v11  ;;  %v573_v54 = vadd.f32 %v566_v61, %v563_v46  ;;  %v574_v40 = vadd.f32 %v566_v61, %v564_v12  ;;  %v1471_v9 = vld [vmem:[#allocation3 + $0x40] sm:$0xff]  ;;  %v1474_v46 = vld [vmem:[#allocation3 + $0x48] sm:$0xff] }
  0xa9   :  { %v575_v48 = vmax.f32 %v567_v13, 0.0  ;;  %v576_v62 = vmax.f32 %v568_v17, 0.0  ;;  %v577_v50 = vmax.f32 %v569_v47, 0.0  ;;  %v578_v26 = vmax.f32 %v570_v18, 0.0  ;;  %v1477_v13 = vld [vmem:[#allocation3 + $0x50] sm:$0xff]  ;;  %v1480_v47 = vld [vmem:[#allocation3 + $0x58] sm:$0xff] }
  0xaa   :  { %v579_v45 = vmax.f32 %v571_v19, 0.0  ;;  %v580_v56 = vmax.f32 %v572_v14, 0.0  ;;  %v581_v57 = vmax.f32 %v573_v54, 0.0  ;;  %v582_v41 = vmax.f32 %v574_v40, 0.0  ;;  %v1483_v19 = vld [vmem:[#allocation3 + $0x60] sm:$0xff]  ;;  %v1486_v54 = vld [vmem:[#allocation3 + $0x68] sm:$0xff] }
  0xab   :  { %v585_v28 = vmul.f32 %v584_v16, %v575_v48  ;;  %v586_v49 = vmul.f32 %v584_v16, %v576_v62  ;;  %v587_v58 = vmul.f32 %v584_v16, %v577_v50  ;;  %v588_v33 = vmul.f32 %v584_v16, %v578_v26  ;;  %v1489_v48 = vld [vmem:[#allocation3 + $0x70] sm:$0xff]  ;;  %v1492_v50 = vld [vmem:[#allocation3 + $0x78] sm:$0xff] }
  0xac   :  { %v589_v25 = vmul.f32 %v584_v16, %v579_v45  ;;  %v590_v52 = vmul.f32 %v584_v16, %v580_v56  ;;  %v591_v59 = vmul.f32 %v584_v16, %v581_v57  ;;  %v592_v61 = vmul.f32 %v584_v16, %v582_v41 }
  0xad   :  { %v1418_v37 = vadd.f32 %v585_v28, %v1314_v27  ;;  %v1421_v38 = vadd.f32 %v586_v49, %v1317_v35  ;;  %v1424_v31 = vadd.f32 %v587_v58, %v1320_v32  ;;  %v1427_v39 = vadd.f32 %v588_v33, %v1323_v21 }
  0xae   :  { %v1430_v29 = vadd.f32 %v589_v25, %v1326_v63  ;;  %v1433_v44 = vadd.f32 %v590_v52, %v1329_v10  ;;  %v1436_v16 = vadd.f32 %v591_v59, %v1332_v55  ;;  %v1439_v27 = vadd.f32 %v592_v61, %v1335_v42  ;;  %v1450_v63 = vld [vmem:[#allocation3 + $0x8] sm:$0xff] }
  0xaf   :  { %v602_v35 = vstv %s1409_s14  ;;  %v612_v53 = vstv %s1411_s15  ;;  %v630_v43 = vstv %s1413_s16  ;;  %v1445_v32 = vstv %s1415_s17 }
  0xb0   :  { %v603_v21 = vmul.f32 %v1447_v24, %v602_v35  ;;  %v604_v10 = vmul.f32 %v1450_v63, %v602_v35  ;;  %v605_v55 = vmul.f32 %v1453_v0, %v602_v35  ;;  %v606_v42 = vmul.f32 %v1456_v1, %v602_v35 }
  0xb1   :  { %v607_v3 = vmul.f32 %v1459_v2, %v602_v35  ;;  %v608_v5 = vmul.f32 %v1462_v4, %v602_v35  ;;  %v609_v7 = vmul.f32 %v1465_v6, %v602_v35  ;;  %v610_v8 = vmul.f32 %v1468_v34, %v602_v35 }
  0xb2   :  { %v613_v11 = vmul.f32 %v1471_v9, %v612_v53  ;;  %v614_v12 = vmul.f32 %v1474_v46, %v612_v53  ;;  %v615_v17 = vmul.f32 %v1477_v13, %v612_v53  ;;  %v616_v18 = vmul.f32 %v1480_v47, %v612_v53 }
  0xb3   :  { %v617_v14 = vmul.f32 %v1483_v19, %v612_v53  ;;  %v618_v40 = vmul.f32 %v1486_v54, %v612_v53  ;;  %v619_v62 = vmul.f32 %v1489_v48, %v612_v53  ;;  %v620_v26 = vmul.f32 %v1492_v50, %v612_v53 }
  0xb4   :  { %v621_v45 = vadd.f32 %v613_v11, %v603_v21  ;;  %v622_v56 = vadd.f32 %v614_v12, %v604_v10  ;;  %v623_v57 = vadd.f32 %v615_v17, %v605_v55  ;;  %v624_v41 = vadd.f32 %v616_v18, %v606_v42 }
  0xb5   :  { %v625_v28 = vadd.f32 %v617_v14, %v607_v3  ;;  %v626_v49 = vadd.f32 %v618_v40, %v608_v5  ;;  %v627_v58 = vadd.f32 %v619_v62, %v609_v7  ;;  %v628_v33 = vadd.f32 %v620_v26, %v610_v8 }
  0xb6   :  { %v631_v25 = vadd.f32 %v630_v43, %v621_v45  ;;  %v632_v52 = vadd.f32 %v630_v43, %v622_v56  ;;  %v633_v59 = vadd.f32 %v630_v43, %v623_v57  ;;  %v634_v61 = vadd.f32 %v630_v43, %v624_v41 }
  0xb7   :  { %v635_v35 = vadd.f32 %v630_v43, %v625_v28  ;;  %v636_v53 = vadd.f32 %v630_v43, %v626_v49  ;;  %v637_v21 = vadd.f32 %v630_v43, %v627_v58  ;;  %v638_v10 = vadd.f32 %v630_v43, %v628_v33 }
  0xb8   :  { %v639_v55 = vmax.f32 %v631_v25, 0.0  ;;  %v640_v42 = vmax.f32 %v632_v52, 0.0  ;;  %v641_v11 = vmax.f32 %v633_v59, 0.0  ;;  %v642_v12 = vmax.f32 %v634_v61, 0.0 }
  0xb9   :  { %v643_v3 = vmax.f32 %v635_v35, 0.0  ;;  %v644_v5 = vmax.f32 %v636_v53, 0.0  ;;  %v645_v7 = vmax.f32 %v637_v21, 0.0  ;;  %v646_v8 = vmax.f32 %v638_v10, 0.0 }
  0xba   :  { %v649_v17 = vmul.f32 %v1445_v32, %v639_v55  ;;  %v650_v18 = vmul.f32 %v1445_v32, %v640_v42  ;;  %v651_v14 = vmul.f32 %v1445_v32, %v641_v11  ;;  %v652_v40 = vmul.f32 %v1445_v32, %v642_v12 }
  0xbb   :  { %v653_v43 = vmul.f32 %v1445_v32, %v643_v3  ;;  %v654_v62 = vmul.f32 %v1445_v32, %v644_v5  ;;  %v655_v26 = vmul.f32 %v1445_v32, %v645_v7  ;;  %v656_v45 = vmul.f32 %v1445_v32, %v646_v8 }
  0xbc   :  { %v1512_v56 = vadd.f32 %v649_v17, %v1366_v36  ;;  %v1515_v57 = vadd.f32 %v650_v18, %v1369_v20  ;;  %v1518_v41 = vadd.f32 %v651_v14, %v1372_v60  ;;  %v1521_v28 = vadd.f32 %v652_v40, %v1375_v51 }
  0xbd   :  { %v1524_v49 = vadd.f32 %v653_v43, %v1378_v30  ;;  %v1527_v58 = vadd.f32 %v654_v62, %v1381_v22  ;;  %v1530_v32 = vadd.f32 %v655_v26, %v1384_v23  ;;  %v1533_v36 = vadd.f32 %v656_v45, %v1387_v15 }
  0xbe   :  { %v666_v20 = vstv %s1495_s18  ;;  %v676_v33 = vstv %s1497_s19  ;;  %v694_v25 = vstv %s1499_s20  ;;  %v712_v60 = vstv %s1501_s21 }
  0xbf   :  { %v667_v52 = vmul.f32 %v1447_v24, %v666_v20  ;;  %v668_v51 = vmul.f32 %v1450_v63, %v666_v20  ;;  %v669_v30 = vmul.f32 %v1453_v0, %v666_v20  ;;  %v670_v59 = vmul.f32 %v1456_v1, %v666_v20 }
  0xc0   :  { %v671_v22 = vmul.f32 %v1459_v2, %v666_v20  ;;  %v672_v23 = vmul.f32 %v1462_v4, %v666_v20  ;;  %v673_v61 = vmul.f32 %v1465_v6, %v666_v20  ;;  %v674_v15 = vmul.f32 %v1468_v34, %v666_v20 }
  0xc1   :  { %v677_v35 = vmul.f32 %v1471_v9, %v676_v33  ;;  %v678_v53 = vmul.f32 %v1474_v46, %v676_v33  ;;  %v679_v24 = vmul.f32 %v1477_v13, %v676_v33  ;;  %v680_v63 = vmul.f32 %v1480_v47, %v676_v33 }
  0xc2   :  { %v681_v0 = vmul.f32 %v1483_v19, %v676_v33  ;;  %v682_v1 = vmul.f32 %v1486_v54, %v676_v33  ;;  %v683_v2 = vmul.f32 %v1489_v48, %v676_v33  ;;  %v684_v4 = vmul.f32 %v1492_v50, %v676_v33 }
  0xc3   :  { %v685_v21 = vadd.f32 %v677_v35, %v667_v52  ;;  %v686_v6 = vadd.f32 %v678_v53, %v668_v51  ;;  %v687_v10 = vadd.f32 %v679_v24, %v669_v30  ;;  %v688_v34 = vadd.f32 %v680_v63, %v670_v59 }
  0xc4   :  { %v689_v55 = vadd.f32 %v681_v0, %v671_v22  ;;  %v690_v9 = vadd.f32 %v682_v1, %v672_v23  ;;  %v691_v42 = vadd.f32 %v683_v2, %v673_v61  ;;  %v692_v46 = vadd.f32 %v684_v4, %v674_v15 }
  0xc5   :  { %v695_v11 = vadd.f32 %v694_v25, %v685_v21  ;;  %v696_v13 = vadd.f32 %v694_v25, %v686_v6  ;;  %v697_v12 = vadd.f32 %v694_v25, %v687_v10  ;;  %v698_v47 = vadd.f32 %v694_v25, %v688_v34 }
  0xc6   :  { %v699_v3 = vadd.f32 %v694_v25, %v689_v55  ;;  %v700_v19 = vadd.f32 %v694_v25, %v690_v9  ;;  %v701_v5 = vadd.f32 %v694_v25, %v691_v42  ;;  %v702_v54 = vadd.f32 %v694_v25, %v692_v46 }
  0xc7   :  { %v703_v7 = vmax.f32 %v695_v11, 0.0  ;;  %v704_v48 = vmax.f32 %v696_v13, 0.0  ;;  %v705_v8 = vmax.f32 %v697_v12, 0.0  ;;  %v706_v50 = vmax.f32 %v698_v47, 0.0 }
  0xc8   :  { %v707_v17 = vmax.f32 %v699_v3, 0.0  ;;  %v708_v18 = vmax.f32 %v700_v19, 0.0  ;;  %v709_v14 = vmax.f32 %v701_v5, 0.0  ;;  %v710_v40 = vmax.f32 %v702_v54, 0.0 }
  0xc9   :  { %v713_v43 = vmul.f32 %v712_v60, %v703_v7  ;;  %v714_v62 = vmul.f32 %v712_v60, %v704_v48  ;;  %v715_v26 = vmul.f32 %v712_v60, %v705_v8  ;;  %v716_v45 = vmul.f32 %v712_v60, %v706_v50 }
  0xca   :  { %v717_v20 = vmul.f32 %v712_v60, %v707_v17  ;;  %v718_v33 = vmul.f32 %v712_v60, %v708_v18  ;;  %v719_v52 = vmul.f32 %v712_v60, %v709_v14  ;;  %v720_v51 = vmul.f32 %v712_v60, %v710_v40 }
  0xcb   :  { %v721_v30 = vadd.f32 %v713_v43, %v1418_v37  ;;  %v722_v25 = vadd.f32 %v714_v62, %v1421_v38  ;;  %v723_v59 = vadd.f32 %v715_v26, %v1424_v31  ;;  %v724_v22 = vadd.f32 %v716_v45, %v1427_v39 }
  0xcc   :  { %v725_v23 = vadd.f32 %v717_v20, %v1430_v29  ;;  %v726_v61 = vadd.f32 %v718_v33, %v1433_v44  ;;  %v727_v15 = vadd.f32 %v719_v52, %v1436_v16  ;;  %v728_v35 = vadd.f32 %v720_v51, %v1439_v27 }
  0xcd   :  { %v729_v53 = vadd.f32 %v721_v30, %v1512_v56  ;;  %v730_v60 = vadd.f32 %v722_v25, %v1515_v57  ;;  %v731_v37 = vadd.f32 %v723_v59, %v1518_v41  ;;  %v732_v38 = vadd.f32 %v724_v22, %v1521_v28 }
  0xce   :  { %v733_v31 = vadd.f32 %v725_v23, %v1524_v49  ;;  %v734_v39 = vadd.f32 %v726_v61, %v1527_v58  ;;  %v735_v29 = vadd.f32 %v727_v15, %v1530_v32  ;;  %v736_v44 = vadd.f32 %v728_v35, %v1533_v36 }
  0xcf   :  { %v738_v16 = vstv %s1581_s4  ;;  %s970_s4 = smov [#allocation11]  }
  0xd0   :  { %v739_v27 = vadd.f32 %v738_v16, %v729_v53  ;;  %v740_v56 = vadd.f32 %v738_v16, %v730_v60  ;;  %v741_v24 = vadd.f32 %v738_v16, %v731_v37  ;;  %v742_v57 = vadd.f32 %v738_v16, %v732_v38  ;;  %s793_s24 = sshll.u32 %s970_s4, 4  ;;  %s794_s24 = int_to_ptr.vmem [resolvable:$true] %s793_s24 }
  0xd1   :  { %v743_v63 = vadd.f32 %v738_v16, %v733_v31  ;;  %v744_v41 = vadd.f32 %v738_v16, %v734_v39  ;;  %v745_v0 = vadd.f32 %v738_v16, %v735_v29  ;;  %v746_v2 = vadd.f32 %v738_v16, %v736_v44  ;;  %s936_s25 = scalar_lea.vmem %s794_s24, 1024  ;;  %p941_p7 = scmp.lt.s32.totalorder %s794_s24, %s794_s24 }
  0xd2   :  { %v747_v28 = vmul.f32 0.5, %v739_v27  ;;  %v748_v1 = vmul.f32 0.5, %v740_v56  ;;  %v749_v49 = vmul.f32 0.5, %v741_v24  ;;  %v750_v58 = vmul.f32 0.5, %v742_v57  ;;  %p937_p6 = scmp.ne.s32.totalorder %s794_s24, %s936_s25  ;;  %p942_p8 = scmp.lt.s32.totalorder %s936_s25, %s936_s25 }
  0xd3   :  { %v751_v4 = vmul.f32 0.5, %v743_v63  ;;  %v752_v32 = vmul.f32 0.5, %v744_v41  ;;  %v753_v36 = vmul.f32 0.5, %v745_v0  ;;  %v754_v21 = vmul.f32 0.5, %v746_v2 }
  0xd4   :  { %848 = vtanh.f32 %v747_v28  ;;  %p943_p9 = por %p942_p8, %p941_p7 }
  0xd5   :  { %850 = vtanh.f32 %v748_v1 }
  0xd6   :  { %852 = vtanh.f32 %v749_v49  ;;  %p944_p10 = pnand %p943_p9, %p937_p6 }
  0xd7   :  { %854 = vtanh.f32 %v750_v58 }
  0xd8   :  { %856 = vtanh.f32 %v751_v4 }
  0xd9   :  { %858 = vtanh.f32 %v752_v32 }
  0xda   :  { %860 = vtanh.f32 %v753_v36 }
  0xdb   :  { %862 = vtanh.f32 %v754_v21 }
  0xe1   :  { %v849_v6 = vpop.eup %848 }
  0xe2   :  { %v851_v10 = vpop.eup %850  ;;  %v763_v34 = vmul.f32 0.5, %v849_v6 }
  0xe3   :  { %v853_v55 = vpop.eup %852  ;;  %v764_v9 = vmul.f32 0.5, %v851_v10 }
  0xe4   :  { %v855_v42 = vpop.eup %854  ;;  %v765_v46 = vmul.f32 0.5, %v853_v55  ;;  %v771_v11 = vadd.f32 0.5, %v763_v34 }
  0xe5   :  { %v857_v13 = vpop.eup %856  ;;  %v766_v12 = vmul.f32 0.5, %v855_v42  ;;  %v772_v47 = vadd.f32 0.5, %v764_v9 }
  0xe6   :  { %v859_v3 = vpop.eup %858  ;;  %v767_v19 = vmul.f32 0.5, %v857_v13  ;;  %v773_v5 = vadd.f32 0.5, %v765_v46  ;;  %779 = vst [vmem:[#allocation11] sm:$0xff] %v771_v11 }
  0xe7   :  { %v861_v54 = vpop.eup %860  ;;  %v768_v7 = vmul.f32 0.5, %v859_v3  ;;  %v774_v48 = vadd.f32 0.5, %v766_v12  ;;  %780 = vst [vmem:[#allocation11 + $0x8] sm:$0xff] %v772_v47 }
  0xe8   :  { %v863_v8 = vpop.eup %862  ;;  %v769_v50 = vmul.f32 0.5, %v861_v54  ;;  %v775_v17 = vadd.f32 0.5, %v767_v19  ;;  %781 = vst [vmem:[#allocation11 + $0x10] sm:$0xff] %v773_v5 }
  0xe9   :  { %v770_v18 = vmul.f32 0.5, %v863_v8  ;;  %v776_v14 = vadd.f32 0.5, %v768_v7  ;;  %782 = vst [vmem:[#allocation11 + $0x18] sm:$0xff] %v774_v48 }
  0xea   :  { %v777_v40 = vadd.f32 0.5, %v769_v50  ;;  %783 = vst [vmem:[#allocation11 + $0x20] sm:$0xff] %v775_v17 }
  0xeb   :  { %v778_v43 = vadd.f32 0.5, %v770_v18  ;;  %784 = vst [vmem:[#allocation11 + $0x28] sm:$0xff] %v776_v14 }
  0xec   :  { %785 = vst [vmem:[#allocation11 + $0x30] sm:$0xff] %v777_v40 }
  0xed   :  { %786 = vst [vmem:[#allocation11 + $0x38] sm:$0xff] %v778_v43 }
  0xee   :  { %947 = shalt.err (!%p944_p10)
}
  0xef   :  { %796 = dma.vmem_to_hbm [thread:$0]  %s794_s24, 1024, %s1582_s5, [#allocation5]  }
  0xf0   :  { %962 = dma.done.wait [#allocation5], 1024  }
  0xf1   :  { %963 = vsyncadd [#allocation5], 4294966272 }
  0xf2   :  { %800 = vsyncpa [#allocation4], 1 }
  0xf3   :  { %801 = vsyncpa [#allocation5], 1 }
  0xf4   :  { %802 = vsyncpa [#allocation6], 1 }
  0xf5   :  { %803 = vsyncpa [#allocation9], 1 }

</bundles_post_ra>
